<compile_context>
chip_gen: v5e
topology: v5e:2x2
jax: 0.10.0
libtpu: 0.0.40
codegen_flags: <defaults>
</compile_context>

<pallas_src>
import functools
import jax
import jax.numpy as jnp
from jax import lax
from jax.experimental import pallas as pl
from jax.experimental.pallas import tpu as pltpu

# ---------------------------------------------------------------------------
# Pallas kernels: matmul with fused bias + (residual) + activation epilogue
# ---------------------------------------------------------------------------

_TM_CANDS = (512, 256, 128, 64, 32, 16)
_TK_CANDS = (2304, 1536, 1152, 768, 512, 384, 256, 128)
_K_SINGLE_MAX = 2304  # above this, tile the K reduction axis


def _apply_act(y, activation):
    if activation == "relu":
        return jnp.maximum(y, 0.0)
    if activation == "elu":
        return jnp.where(y > 0.0, y, jnp.expm1(jnp.minimum(y, 0.0)))
    if activation == "sigmoid":
        return 1.0 / (1.0 + jnp.exp(-y))
    return y


def _mm_single_kernel(*refs, activation, has_res):
    """Single K block: one dot, fused epilogue, no accumulator scratch."""
    if has_res:
        a_ref, b_ref, bias_ref, res_ref, o_ref = refs
    else:
        a_ref, b_ref, bias_ref, o_ref = refs
        res_ref = None
    y = jnp.dot(a_ref[...], b_ref[...], preferred_element_type=jnp.float32)
    y = y + bias_ref[...]
    if res_ref is not None:
        y = y + res_ref[...].astype(jnp.float32)
    y = _apply_act(y, activation)
    o_ref[...] = y.astype(o_ref.dtype)


def _mm_ktiled_kernel(*refs, activation, has_res):
    """K-tiled reduction with f32 VMEM accumulator and fused epilogue."""
    if has_res:
        a_ref, b_ref, bias_ref, res_ref, o_ref, acc_ref = refs
    else:
        a_ref, b_ref, bias_ref, o_ref, acc_ref = refs
        res_ref = None

    @pl.when(pl.program_id(2) == 0)
    def _init():
        acc_ref[...] = jnp.zeros_like(acc_ref)

    acc_ref[...] += jnp.dot(a_ref[...], b_ref[...],
                            preferred_element_type=jnp.float32)

    @pl.when(pl.program_id(2) == pl.num_programs(2) - 1)
    def _finalize():
        y = acc_ref[...] + bias_ref[...]
        if res_ref is not None:
            y = y + res_ref[...].astype(jnp.float32)
        y = _apply_act(y, activation)
        o_ref[...] = y.astype(o_ref.dtype)


def _round_up(x, m):
    return ((x + m - 1) // m) * m


def _pick_tm(mp):
    for t in _TM_CANDS:
        if mp % t == 0:
            return t
    return 16  # unreachable: mp is always a multiple of 16


def _pick_tk(k):
    for t in _TK_CANDS:
        if k % t == 0 and k // t >= 2:
            return t
    return None


def matmul_bias_act(a, w_packed, bias_packed, n_true, activation="none",
                    residual=None, out_dtype=jnp.bfloat16):
    """a: (M, K) any float; w_packed: (K, Np) bf16; bias_packed: (1, Np) f32.
    Returns act(a @ w + bias [+ residual]) sliced to (M, n_true)."""
    M, K = a.shape
    Kw, Np = w_packed.shape
    assert K == Kw

    a = a.astype(jnp.bfloat16)
    Mp = _round_up(M, 16)
    if Mp != M:
        a = jnp.pad(a, ((0, Mp - M), (0, 0)))

    TM = _pick_tm(Mp)
    TN = 256 if Np % 256 == 0 else 128

    has_res = residual is not None
    inputs = [a, w_packed, bias_packed]
    if has_res:
        r = residual.astype(jnp.bfloat16)
        rm, rn = r.shape
        if rm != Mp or rn != Np:
            r = jnp.pad(r, ((0, Mp - rm), (0, Np - rn)))
        inputs.append(r)

    out_bytes = jnp.dtype(out_dtype).itemsize
    cost = pl.CostEstimate(
        flops=2 * Mp * K * Np,
        transcendentals=(Mp * Np if activation in ("elu", "sigmoid") else 0),
        bytes_accessed=(Mp * K * 2 + K * Np * 2 + Np * 4 + Mp * Np * out_bytes
                        + (Mp * Np * 2 if has_res else 0)),
    )

    tk = _pick_tk(K) if K > _K_SINGLE_MAX else None

    if tk is None:
        # -------- no K axis: single dot per (i, j) tile --------
        in_specs = [
            pl.BlockSpec((TM, K), lambda i, j: (i, 0)),
            pl.BlockSpec((K, TN), lambda i, j: (0, j)),
            pl.BlockSpec((1, TN), lambda i, j: (0, j)),
        ]
        if has_res:
            in_specs.append(pl.BlockSpec((TM, TN), lambda i, j: (i, j)))
        grid_spec = pltpu.PrefetchScalarGridSpec(
            num_scalar_prefetch=0,
            grid=(Mp // TM, Np // TN),
            in_specs=in_specs,
            out_specs=pl.BlockSpec((TM, TN), lambda i, j: (i, j)),
        )
        kernel = functools.partial(_mm_single_kernel, activation=activation,
                                   has_res=has_res)
        dims = ("parallel", "parallel")
    else:
        # -------- tiled K reduction with VMEM f32 accumulator --------
        in_specs = [
            pl.BlockSpec((TM, tk), lambda i, j, k: (i, k)),
            pl.BlockSpec((tk, TN), lambda i, j, k: (k, j)),
            pl.BlockSpec((1, TN), lambda i, j, k: (0, j)),
        ]
        if has_res:
            in_specs.append(pl.BlockSpec((TM, TN), lambda i, j, k: (i, j)))
        grid_spec = pltpu.PrefetchScalarGridSpec(
            num_scalar_prefetch=0,
            grid=(Mp // TM, Np // TN, K // tk),
            in_specs=in_specs,
            out_specs=pl.BlockSpec((TM, TN), lambda i, j, k: (i, j)),
            scratch_shapes=[pltpu.VMEM((TM, TN), jnp.float32)],
        )
        kernel = functools.partial(_mm_ktiled_kernel, activation=activation,
                                   has_res=has_res)
        dims = ("parallel", "parallel", "arbitrary")

    out = pl.pallas_call(
        kernel,
        out_shape=jax.ShapeDtypeStruct((Mp, Np), out_dtype),
        grid_spec=grid_spec,
        compiler_params=pltpu.CompilerParams(dimension_semantics=dims),
        cost_estimate=cost,
    )(*inputs)
    return out[:M, :n_true]


# ---------------------------------------------------------------------------
# Conv2d via im2col (bf16) + Pallas matmul with fused epilogue
# ---------------------------------------------------------------------------

def conv2d(x, p, *, stride=1, padding=0, pad_mode="zero", activation="none",
           residual=None, out_dtype=jnp.bfloat16):
    """x: NHWC (bf16), p: pre-packed conv params, residual: NHWC or None."""
    kh, kw, cin, cout = p["kh"], p["kw"], p["cin"], p["cout"]
    if padding > 0:
        mode = "reflect" if pad_mode == "reflect" else "constant"
        x = jnp.pad(x, ((0, 0), (padding, padding), (padding, padding), (0, 0)),
                    mode=mode)
    n, h, wd, c = x.shape
    assert c == cin
    ho = (h - kh) // stride + 1
    wo = (wd - kw) // stride + 1

    # TODO(synk): fold the (dy,dx) taps into the K grid of the Pallas kernel
    # (direct conv) so the kh*kw-expanded patches tensor never hits HBM.
    if kh == 1 and kw == 1 and stride == 1:
        a = x.reshape(n * ho * wo, cin)
    else:
        cols = [x[:, dy:dy + (ho - 1) * stride + 1:stride,
                  dx:dx + (wo - 1) * stride + 1:stride, :]
                for dy in range(kh) for dx in range(kw)]
        a = jnp.concatenate(cols, axis=-1).reshape(n * ho * wo, kh * kw * cin)

    res2d = None
    if residual is not None:
        res2d = residual.reshape(n * ho * wo, cout)

    out = matmul_bias_act(a, p["w"], p["b"], cout, activation,
                          residual=res2d, out_dtype=out_dtype)
    return out.reshape(n, ho, wo, cout)


# ---------------------------------------------------------------------------
# Glue ops (plain JAX, bf16): maxpool, bilinear x2 upsample (align_corners=False)
# ---------------------------------------------------------------------------

def maxpool3x3_s2_p1(x):
    init = jnp.array(-jnp.inf, dtype=x.dtype)
    return lax.reduce_window(
        x, init, lax.max,
        window_dimensions=(1, 3, 3, 1),
        window_strides=(1, 2, 2, 1),
        padding=((0, 0), (1, 1), (1, 1), (0, 0)))


def upsample2x_bilinear(x):
    n, h, w, c = x.shape

    def src(out_len, in_len):
        s = jnp.maximum((jnp.arange(out_len, dtype=jnp.float32) + 0.5) * 0.5 - 0.5, 0.0)
        i0 = jnp.floor(s).astype(jnp.int32)
        frac = s - i0
        i0 = jnp.clip(i0, 0, in_len - 1)
        i1 = jnp.clip(i0 + 1, 0, in_len - 1)
        return i0, i1, frac

    y0, y1, fy = src(2 * h, h)
    x0, x1, fx = src(2 * w, w)
    fy = fy.astype(x.dtype)      # fracs are 0 / 0.25 / 0.75 -> exact in bf16
    fx = fx.astype(x.dtype)
    rows = x[:, y0, :, :] * (1.0 - fy)[None, :, None, None] \
         + x[:, y1, :, :] * fy[None, :, None, None]
    out = rows[:, :, x0, :] * (1.0 - fx)[None, None, :, None] \
        + rows[:, :, x1, :] * fx[None, None, :, None]
    return out


# ---------------------------------------------------------------------------
# Parameter construction (deterministic, synthetic, pre-packed for the MXU)
# ---------------------------------------------------------------------------

NUM_CH_ENC = [64, 64, 128, 256, 512]
NUM_CH_DEC = [16, 32, 64, 128, 256]


def _make_conv(key, cout, cin, kh, kw):
    """Returns DMA-ready packed weights: w (K, Np) bf16, b (1, Np) f32."""
    k1, k2 = jax.random.split(key)
    fan = cin * kh * kw
    w = jax.random.normal(k1, (cout, cin, kh, kw), jnp.float32) * (2.0 / fan) ** 0.5
    b = jax.random.normal(k2, (cout,), jnp.float32) * 0.01
    K = kh * kw * cin
    Np = _round_up(cout, 128)
    wm = jnp.transpose(w, (2, 3, 1, 0)).reshape(K, cout)           # (K, Cout)
    wm = jnp.pad(wm, ((0, 0), (0, Np - cout))).astype(jnp.bfloat16)
    bias = jnp.pad(b, (0, Np - cout)).reshape(1, Np).astype(jnp.float32)
    return {"w": wm, "b": bias, "cout": cout, "cin": cin, "kh": kh, "kw": kw}


def init_params(key, depth_scale):
    keys = iter(jax.random.split(key, 128))
    nk = lambda: next(keys)

    enc = {"conv1": _make_conv(nk(), 64, 3, 7, 7), "layers": []}
    layer_cfg = [(64, 64, 1), (64, 128, 2), (128, 256, 2), (256, 512, 2)]
    for cin, cout, stride in layer_cfg:
        blocks = []
        for bi in range(2):
            s = stride if bi == 0 else 1
            bcin = cin if bi == 0 else cout
            blk = {
                "stride": s,
                "conv1": _make_conv(nk(), cout, bcin, 3, 3),
                "conv2": _make_conv(nk(), cout, cout, 3, 3),
            }
            if bi == 0 and (s != 1 or bcin != cout):
                blk["ds"] = _make_conv(nk(), cout, bcin, 1, 1)
            blocks.append(blk)
        enc["layers"].append(blocks)

    dec = {"upconvs": [], "dispconvs": []}
    for i in range(4, -1, -1):
        nin0 = NUM_CH_ENC[-1] if i == 4 else NUM_CH_DEC[i + 1]
        nout = NUM_CH_DEC[i]
        c0 = _make_conv(nk(), nout, nin0, 3, 3)
        nin1 = nout + (NUM_CH_ENC[i - 1] if i > 0 else 0)
        c1 = _make_conv(nk(), nout, nin1, 3, 3)
        dec["upconvs"].append((c0, c1))
    for s in range(depth_scale):
        dec["dispconvs"].append(_make_conv(nk(), 1, NUM_CH_DEC[s], 3, 3))

    return {"enc": enc, "dec": dec}


# ---------------------------------------------------------------------------
# Forward pass (matches Depth_Model_old.forward semantics)
# ---------------------------------------------------------------------------

def _basic_block(x, blk):
    out = conv2d(x, blk["conv1"], stride=blk["stride"], padding=1,
                 pad_mode="zero", activation="relu")
    if "ds" in blk:
        identity = conv2d(x, blk["ds"], stride=blk["stride"], padding=0,
                          activation="none")
    else:
        identity = x
    # residual add + ReLU fused into the second conv's matmul epilogue
    return conv2d(out, blk["conv2"], stride=1, padding=1, pad_mode="zero",
                  activation="relu", residual=identity)


def encoder_forward(enc, img_nhwc):
    x = ((img_nhwc - 0.45) / 0.225).astype(jnp.bfloat16)
    x = conv2d(x, enc["conv1"], stride=2, padding=3, pad_mode="zero",
               activation="relu")
    feats = [x]
    x = maxpool3x3_s2_p1(feats[-1])
    for layer in enc["layers"]:
        for blk in layer:
            x = _basic_block(x, blk)
        feats.append(x)
    return feats


def decoder_forward(dec, feats, depth_scale):
    x = feats[-1]
    outputs = {}
    for scale in range(4, -1, -1):
        idx = 4 - scale
        c0, c1 = dec["upconvs"][idx]
        x = conv2d(x, c0, stride=1, padding=1, pad_mode="reflect",
                   activation="elu")
        x = upsample2x_bilinear(x)
        if scale > 0:
            x = jnp.concatenate([x, feats[scale - 1]], axis=-1)
        x = conv2d(x, c1, stride=1, padding=1, pad_mode="reflect",
                   activation="elu")
        if scale < depth_scale:
            outputs[scale] = conv2d(x, dec["dispconvs"][scale], stride=1,
                                    padding=1, pad_mode="reflect",
                                    activation="sigmoid",
                                    out_dtype=jnp.float32)
    return [outputs[i] for i in range(depth_scale)]


def depth_model_forward(params, img_nchw, depth_scale):
    img_nhwc = jnp.transpose(img_nchw, (0, 2, 3, 1))
    feats = encoder_forward(params["enc"], img_nhwc)
    disp_list = decoder_forward(params["dec"], feats, depth_scale)
    # back to PyTorch NCHW layout
    return [jnp.transpose(d, (0, 3, 1, 2)) for d in disp_list]


# ---------------------------------------------------------------------------
# Main
# ---------------------------------------------------------------------------

if __name__ == "__main__":
    depth_scale = 4
    key = jax.random.PRNGKey(0)
    k_img, k_par = jax.random.split(key)

    # Small input consistent with the module: NCHW image, H,W divisible by 32.
    img = jax.random.uniform(k_img, (1, 3, 64, 64), jnp.float32)
    params = init_params(k_par, depth_scale)

    disp_list = depth_model_forward(params, img, depth_scale)
    disp_list = [jax.block_until_ready(d) for d in disp_list]

    expected = [(1, 1, 64, 64), (1, 1, 32, 32), (1, 1, 16, 16), (1, 1, 8, 8)]
    for d, shp in zip(disp_list, expected):
        assert d.shape == shp, (d.shape, shp)
        assert bool(jnp.all((d >= 0.0) & (d <= 1.0)))  # sigmoid output range

    print("KERNEL_OK")
</pallas_src>

<mosaic_0001>
module attributes {stable_mosaic.version = 11 : i64} {
  func.func @_mm_single_kernel(%arg0: i32, %arg1: i32, %arg2: memref<512x147xbf16, #tpu.memory_space<vmem>>, %arg3: memref<147x128xbf16, #tpu.memory_space<vmem>>, %arg4: memref<1x128xf32, #tpu.memory_space<vmem>>, %arg5: memref<512x128xbf16, #tpu.memory_space<vmem>>) attributes {dimension_semantics = [#tpu.dimension_semantics<parallel>, #tpu.dimension_semantics<parallel>], iteration_bounds = array<i64: 2, 1>, scalar_prefetch = 0 : i64, scratch_operands = 0 : i64, tpu.core_type = #tpu.core_type<tc>, window_params = [{transform_indices = @transform_0, window_bounds = array<i64: 512, 147>}, {transform_indices = @transform_1, window_bounds = array<i64: 147, 128>}, {transform_indices = @transform_2, window_bounds = array<i64: 1, 128>}, {transform_indices = @transform_3, window_bounds = array<i64: 512, 128>}]} {
    %c0 = arith.constant 0 : index
    %c0_0 = arith.constant 0 : index
    %0 = vector.load %arg2[%c0, %c0_0] : memref<512x147xbf16, #tpu.memory_space<vmem>>, vector<512x147xbf16>
    %c0_1 = arith.constant 0 : index
    %c0_2 = arith.constant 0 : index
    %1 = vector.load %arg3[%c0_1, %c0_2] : memref<147x128xbf16, #tpu.memory_space<vmem>>, vector<147x128xbf16>
    %cst = arith.constant dense<0.000000e+00> : vector<512x128xf32>
    %2 = tpu.matmul %0, %1, %cst {dimension_numbers = #tpu.dot_dimension_numbers<[1], [0], [0], [1], [0, 0, 1, 1], [], []>} : vector<512x147xbf16>, vector<147x128xbf16>, vector<512x128xf32> -> vector<512x128xf32>
    %c0_3 = arith.constant 0 : index
    %c0_4 = arith.constant 0 : index
    %3 = vector.load %arg4[%c0_3, %c0_4] : memref<1x128xf32, #tpu.memory_space<vmem>>, vector<1x128xf32>
    %4 = vector.broadcast %3 : vector<1x128xf32> to vector<512x128xf32>
    %5 = arith.addf %2, %4 : vector<512x128xf32>
    %cst_5 = arith.constant 0.000000e+00 : f32
    %6 = vector.broadcast %cst_5 : f32 to vector<512x128xf32>
    %7 = arith.maximumf %5, %6 : vector<512x128xf32>
    %8 = arith.truncf %7 : vector<512x128xf32> to vector<512x128xbf16>
    %c0_6 = arith.constant 0 : index
    %c0_7 = arith.constant 0 : index
    %9 = vector.load %arg5[%c0_6, %c0_7] : memref<512x128xbf16, #tpu.memory_space<vmem>>, vector<512x128xbf16>
    tpu.vector_store %arg5[%c0_6, %c0_7], %8 {strides = array<i32>} : memref<512x128xbf16, #tpu.memory_space<vmem>>, vector<512x128xbf16>,
    return
  }
  func.func @transform_0(%arg0: i32, %arg1: i32) -> (i32, i32) {
    %c0_i32 = arith.constant 0 : i32
    %c0_i32_0 = arith.constant 0 : i32
    return %arg0, %c0_i32 : i32, i32
  }
  func.func @transform_1(%arg0: i32, %arg1: i32) -> (i32, i32) {
    %c0_i32 = arith.constant 0 : i32
    %c0_i32_0 = arith.constant 0 : i32
    return %c0_i32, %arg1 : i32, i32
  }
  func.func @transform_2(%arg0: i32, %arg1: i32) -> (i32, i32) {
    %c0_i32 = arith.constant 0 : i32
    %c0_i32_0 = arith.constant 0 : i32
    return %c0_i32, %arg1 : i32, i32
  }
  func.func @transform_3(%arg0: i32, %arg1: i32) -> (i32, i32) {
    %c0_i32 = arith.constant 0 : i32
    return %arg0, %arg1 : i32, i32
  }
}

</mosaic_0001>

<bundles_post_ra>
// kernel: tpu_custom_call.1
= control target key start
LH: loop header
LB: loop body
LE: loop exit
PB: predicated region body
PF: predicated region fallthrough
CT: control target
= control target key end

     0   :  { %8 = vsyncpa [#allocation3], 0  ;;  %s2634_s0 = inlined_call_operand.vmem [shape: bf16[1024,147], index: 0, kind: input, shape index: {}]   ;;  %s2635_s1 = inlined_call_operand.vmem [shape: bf16[147,128], index: 1, kind: input, shape index: {}]   ;;  %s2636_s2 = inlined_call_operand.vmem [shape: f32[1,128], index: 2, kind: input, shape index: {}]   ;;  %s2637_s3 = inlined_call_operand.hbm [shape: bf16[1024,128], index: 3, kind: output, shape index: {}]  }
   0x1   :  { %10 = vsyncpa [#allocation3 + $0x1], 0  ;;  %s2181_s12 = smov 0   ;;  %s2183_s13 = smov 0  }
   0x2   :  { %s2185_s14 = smov 0   ;;  %s2187_s15 = smov 0  }
   0x3   :  { %s2189_s16 = smov 0   ;;  %s2191_s17 = smov 0  }
   0x4 LB: > { %s1403_s18 = sadd.s32 4294967295, %s2156_s17   ;;  %s1404_s19 = sadd.s32 4294967294, %s2156_s17   ;;  %s2156_s17 = sphi %s2191_s17, %s16_s17   ;;  %s2152_s16 = sphi %s2189_s16, %s2644_s16   ;;  %s2148_s15 = sphi %s2187_s15, %s2643_s15   ;;  %s2144_s14 = sphi %s2185_s14, %s2642_s14   ;;  %s2140_s13 = sphi %s2183_s13, %s2641_s13   ;;  %s2136_s12 = sphi %s2181_s12, %s2640_s12  }
   0x5   : > { %s28_s20 = sadd.s32 1, %s2152_s16  ;;  %s115_s21 = sadd.s32 1, %s2144_s14 }
   0x6   : > { %p30_p0 = scmp.ge.s32.totalorder %s28_s20, 2  ;;  %p125_p1 = scmp.ne.s32.totalorder %s2144_s14, %s2140_s13 }
   0x7   : > { %p126_p2 = scmp.eq.s32.totalorder %s1403_s18, 1  ;;  %p131_p3 = scmp.ne.s32.totalorder %s2140_s13, %s2136_s12 }
   0x8   : > { %s2646_s20 = smov (%p30_p0, %s28_s20), 0  ;;  %p132_p5 = scmp.eq.s32.totalorder %s1404_s19, 1 }
   0x9   : > { %p2221_p4 = por %p126_p2, %p125_p1  ;;  %s110_s23 = ssub.s32 %s2152_s16, %s2646_s20 }
   0xa   : > { %p1409_p6 = scmp.ge.s32.totalorder %s2156_s17, 1  ;;  %p113_p7 = scmp.eq.s32.totalorder %s110_s23, 0 }
   0xb   : > { %p2228_p8 = por %p132_p5, %p131_p3  ;;  %p173_p9 = scmp.lt.s32.totalorder %s2156_s17, 3 }
   0xc   : > { %s2234_s25 = scalar_select %p113_p7, %s2144_s14, %s115_s21  }
   0xd   : > { %p174_p10 = pnand %p1409_p6, %p173_p9 }
   0xe   : > { %s1411_s30 = sshll.u32 (!%p174_p10), %s2148_s15, 6  ;;  %s202_s9 = sand.u32 (!%p174_p10), 1, %s2140_s13  }
   0xf   : > { %177 = sbr.rel (%p174_p10) target bundleno = 444 (0x1bc), region = 32  ;;  %p206_p11 = scmp.lt.s32.totalorder (!%p174_p10), %s1411_s30, 127 }
  0x10   : > { %s1410_s10 = sshll.u32 (!%p174_p10), %s202_s9, 8  ;;  %s1817_s18 = sshll.u32 (!%p174_p10), %s2148_s15, 8 }
  0x11   : > { %s2399_s11 = scalar_lea.vmem (!%p174_p10), [#allocation2], %s1410_s10  ;;  %s1300_s23 = scalar_lea.hbm (!%p174_p10), %s2637_s3, %s1817_s18 }
  0x12   : > { %s1301_s26 = sshll.u32 (!%p174_p10), %s2399_s11, 4  ;;  %s1303_s27 = sshll.u32 (!%p174_p10), %s1300_s23, 4  ;;  %s1302_s26 = int_to_ptr.vmem [resolvable:$true] %s1301_s26  ;;  %s1304_s27 = int_to_ptr.hbm [resolvable:$true] %s1303_s27 }
  0x13   : > { %s1288_s15 = scalar_lea.sflag (!%p174_p10), [#allocation3], %s202_s9  ;;  %s2092_s28 = sshra.s32 (!%p174_p10), %s1304_s27, 4  ;;  %s2093_s28 = int_to_ptr.hbm [resolvable:$true] %s2092_s28 }
  0x14   : > { %v1815_v0 = vld [vmem:[%s2635_s1 + $0x38] sm:$0xff]  ;;  %v303_v1 = vld [vmem:[%s2635_s1 + $0x48] sm:$0x3]  ;;  %vm750_vm0 = vcmask 1040384   ;;  %vm751_vm1 = vcmask 1041408   ;;  %v1814_v3 = vld [vmem:[%s2635_s1 + $0x30] sm:$0xff]  ;;  %p2099_p1 = scmp.lt.s32.totalorder %s2093_s28, %s2637_s3 }
  0x15   : > { %v633_v2 = vunpack.c.l.b16 %v303_v1  ;;  %757 = vmatpush.bf16.msra.mxu0 %v1815_v0  ;;  %2009 = vmatpush.bf16.msra.mxu2 %v1815_v0  ;;  %v2158_v4 = vmov 65535   ;;  %s2648_s30 = smov (!%p206_p11, %s1411_s30), 127  ;;  %v1813_v9 = vld [vmem:[%s2635_s1 + $0x28] sm:$0xff]  ;;  %v1816_v10 = vld [vmem:[%s2635_s1 + $0x40] sm:$0xff]  ;;  %vm653_vm2 = vcmask 154624   ;;  %v1811_v18 = vld [vmem:[%s2635_s1 + $0x18] sm:$0xff] }
  0x16   : > { %v752_v5 = vsel %vm750_vm0, 4294967295, %v2158_v4  ;;  %s1743_s8 = sshll.u32 %s2648_s30, 3  ;;  %v1812_v14 = vld [vmem:[%s2635_s1 + $0x20] sm:$0xff]  ;;  %v1810_v19 = vld [vmem:[%s2635_s1 + $0x10] sm:$0xff]  ;;  %v1809_v20 = vld [vmem:[%s2635_s1 + $0x8] sm:$0xff]  ;;  %s2094_s29 = scalar_lea.hbm %s2093_s28, 256 }
  0x17   : > { %v643_v6 = vpack.c.b16 %v633_v2, %v633_v2  ;;  %v753_v7 = vsel %vm751_vm1, %v752_v5, 0  ;;  %s2255_s19 = scalar_lea.vmem %s2634_s0, %s1743_s8  ;;  %v1808_v26 = vld [vmem:[%s2635_s1] sm:$0xff]  ;;  %p2095_p12 = scmp.ne.s32.totalorder %s2093_s28, %s2094_s29 }
  0x18   : > { %v1744_v11 = vld [vmem:[%s2255_s19 + $0x4] sm:$0xf]  ;;  %v1418_v12 = vld [vmem:[%s2255_s19 + $0x8] sm:$0xf0]  ;;  %v1778_v15 = vld [vmem:[%s2255_s19 + $0x114] sm:$0xf] }
  0x19   : > { %v755_v8 = vand.u32 %v753_v7, %v643_v6  ;;  %758 = vmatpush.bf16.msra.mxu0 %v1814_v3  ;;  %2010 = vmatpush.bf16.msra.mxu2 %v1814_v3  ;;  %v1421_v13 = vor.u32 %v1744_v11, %v1418_v12  ;;  %v1554_v16 = vld [vmem:[%s2255_s19 + $0x118] sm:$0xf0]  ;;  %v1746_v21 = vld [vmem:[%s2255_s19 + $0x14] sm:$0xf]  ;;  %v1780_v23 = vld [vmem:[%s2255_s19 + $0x124] sm:$0xf]  ;;  %p2096_p13 = pnand %p2095_p12, %p2221_p4 }
  0x1a   : > { %v1557_v17 = vor.u32 %v1778_v15, %v1554_v16  ;;  %v1426_v22 = vld [vmem:[%s2255_s19 + $0x18] sm:$0xf0]  ;;  %v1562_v24 = vld [vmem:[%s2255_s19 + $0x128] sm:$0xf0]  ;;  %v1416_v27 = vld [vmem:[%s2255_s19] sm:$0xf] }
  0x1b   : > { %932 = vmatpush.bf16.msra.mxu1 %v755_v8  ;;  %2017 = vmatpush.bf16.msra.mxu3 %v755_v8  ;;  %v1429_v25 = vor.u32 %v1746_v21, %v1426_v22  ;;  %v1745_v28 = vld [vmem:[%s2255_s19 + $0x4] sm:$0xf0]  ;;  %v1544_v29 = vld [vmem:[%s2255_s19 + $0x100] sm:$0xf]  ;;  %v1565_v31 = vor.u32 %v1780_v23, %v1562_v24  ;;  %v1748_v34 = vld [vmem:[%s2255_s19 + $0x24] sm:$0xf]  ;;  %p2097_p0 = pneg %p2096_p13 }
  0x1c   : > { %v1777_v30 = vld [vmem:[%s2255_s19 + $0x104] sm:$0xf0]  ;;  %v1417_v32 = vor.u32 %v1745_v28, %v1416_v27  ;;  %v1434_v35 = vld [vmem:[%s2255_s19 + $0x28] sm:$0xf0]  ;;  %v1782_v36 = vld [vmem:[%s2255_s19 + $0x134] sm:$0xf] }
  0x1d   : > { %759 = vmatpush.bf16.msra.mxu0 %v1813_v9  ;;  %2011 = vmatpush.bf16.msra.mxu2 %v1813_v9  ;;  %v1545_v33 = vor.u32 %v1777_v30, %v1544_v29  ;;  %v1570_v37 = vld [vmem:[%s2255_s19 + $0x138] sm:$0xf0]  ;;  %v1437_v38 = vor.u32 %v1748_v34, %v1434_v35  ;;  %v1424_v39 = vld [vmem:[%s2255_s19 + $0x10] sm:$0xf]  ;;  %v1747_v40 = vld [vmem:[%s2255_s19 + $0x14] sm:$0xf0] }
  0x1e   : > { %v1552_v41 = vld [vmem:[%s2255_s19 + $0x110] sm:$0xf]  ;;  %v1779_v42 = vld [vmem:[%s2255_s19 + $0x114] sm:$0xf0]  ;;  %v1573_v43 = vor.u32 %v1782_v36, %v1570_v37  ;;  %v1425_v44 = vor.u32 %v1747_v40, %v1424_v39  ;;  %v1750_v46 = vld [vmem:[%s2255_s19 + $0x34] sm:$0xf] }
  0x1f   : > { %933 = vmatpush.bf16.msra.mxu1 %v1816_v10  ;;  %2018 = vmatpush.bf16.msra.mxu3 %v1816_v10  ;;  %v1553_v45 = vor.u32 %v1779_v42, %v1552_v41  ;;  %v1442_v47 = vld [vmem:[%s2255_s19 + $0x38] sm:$0xf0]  ;;  %v1784_v48 = vld [vmem:[%s2255_s19 + $0x144] sm:$0xf]  ;;  %v1578_v49 = vld [vmem:[%s2255_s19 + $0x148] sm:$0xf0] }
  0x20   : > { %v1445_v50 = vor.u32 %v1750_v46, %v1442_v47  ;;  %v1432_v51 = vld [vmem:[%s2255_s19 + $0x20] sm:$0xf]  ;;  %v1749_v52 = vld [vmem:[%s2255_s19 + $0x24] sm:$0xf0]  ;;  %v1581_v55 = vor.u32 %v1784_v48, %v1578_v49  ;;  %v1752_v58 = vld [vmem:[%s2255_s19 + $0x44] sm:$0xf] }
  0x21   : > { %760 = vmatpush.bf16.msra.mxu0 %v1812_v14  ;;  %2012 = vmatpush.bf16.msra.mxu2 %v1812_v14  ;;  %v1560_v53 = vld [vmem:[%s2255_s19 + $0x120] sm:$0xf]  ;;  %v1781_v54 = vld [vmem:[%s2255_s19 + $0x124] sm:$0xf0]  ;;  %v1433_v56 = vor.u32 %v1749_v52, %v1432_v51  ;;  %v1450_v59 = vld [vmem:[%s2255_s19 + $0x48] sm:$0xf0] }
  0x22   : > { %1706 = vmatmul.msk.bf16.vlgmr.msra.gmra.mxu1 %vm653_vm2, %v1421_v13  ;;  %1723 = vmatmul.msk.bf16.vlgmr.msra.gmra.mxu3 %vm653_vm2, %v1557_v17  ;;  %v1561_v57 = vor.u32 %v1781_v54, %v1560_v53  ;;  %v1786_v60 = vld [vmem:[%s2255_s19 + $0x154] sm:$0xf]  ;;  %v1586_v61 = vld [vmem:[%s2255_s19 + $0x158] sm:$0xf0]  ;;  %v1453_v62 = vor.u32 %v1752_v58, %v1450_v59  ;;  %v1440_v63 = vld [vmem:[%s2255_s19 + $0x30] sm:$0xf] }
  0x23   : > { %v1751_v0 = vld [vmem:[%s2255_s19 + $0x34] sm:$0xf0]  ;;  %v1568_v1 = vld [vmem:[%s2255_s19 + $0x130] sm:$0xf]  ;;  %v1589_v3 = vor.u32 %v1786_v60, %v1586_v61  ;;  %v1754_v6 = vld [vmem:[%s2255_s19 + $0x54] sm:$0xf] }
  0x24   : > { %v1783_v2 = vld [vmem:[%s2255_s19 + $0x134] sm:$0xf0]  ;;  %v1441_v4 = vor.u32 %v1751_v0, %v1440_v63  ;;  %v1458_v7 = vld [vmem:[%s2255_s19 + $0x58] sm:$0xf0]  ;;  %v1788_v8 = vld [vmem:[%s2255_s19 + $0x164] sm:$0xf] }
  0x25   : > { %761 = vmatpush.bf16.msra.mxu0 %v1811_v18  ;;  %2013 = vmatpush.bf16.msra.mxu2 %v1811_v18  ;;  %v1569_v5 = vor.u32 %v1783_v2, %v1568_v1  ;;  %v1594_v9 = vld [vmem:[%s2255_s19 + $0x168] sm:$0xf0]  ;;  %v1461_v10 = vor.u32 %v1754_v6, %v1458_v7  ;;  %v1448_v11 = vld [vmem:[%s2255_s19 + $0x40] sm:$0xf]  ;;  %v1753_v12 = vld [vmem:[%s2255_s19 + $0x44] sm:$0xf0] }
  0x26   : > { %v1576_v13 = vld [vmem:[%s2255_s19 + $0x140] sm:$0xf]  ;;  %v1785_v14 = vld [vmem:[%s2255_s19 + $0x144] sm:$0xf0]  ;;  %v1597_v15 = vor.u32 %v1788_v8, %v1594_v9  ;;  %v1449_v16 = vor.u32 %v1753_v12, %v1448_v11  ;;  %v1756_v18 = vld [vmem:[%s2255_s19 + $0x64] sm:$0xf] }
  0x27   : > { %v1577_v17 = vor.u32 %v1785_v14, %v1576_v13  ;;  %v1602_v21 = vld [vmem:[%s2255_s19 + $0x178] sm:$0xf0]  ;;  %v1456_v23 = vld [vmem:[%s2255_s19 + $0x50] sm:$0xf]  ;;  %v1755_v24 = vld [vmem:[%s2255_s19 + $0x54] sm:$0xf0] }
  0x28   : > { %v1457_v28 = vor.u32 %v1755_v24, %v1456_v23  ;;  %v1758_v30 = vld [vmem:[%s2255_s19 + $0x74] sm:$0xf]  ;;  %v1464_v35 = vld [vmem:[%s2255_s19 + $0x60] sm:$0xf]  ;;  %v1757_v36 = vld [vmem:[%s2255_s19 + $0x64] sm:$0xf0] }
  0x29   : > { %762 = vmatpush.bf16.msra.mxu0 %v1810_v19  ;;  %2014 = vmatpush.bf16.msra.mxu2 %v1810_v19  ;;  %v1466_v19 = vld [vmem:[%s2255_s19 + $0x68] sm:$0xf0]  ;;  %v1592_v37 = vld [vmem:[%s2255_s19 + $0x160] sm:$0xf]  ;;  %v1465_v40 = vor.u32 %v1757_v36, %v1464_v35  ;;  %v1760_v42 = vld [vmem:[%s2255_s19 + $0x84] sm:$0xf] }
  0x2a   : > { %v1469_v22 = vor.u32 %v1756_v18, %v1466_v19  ;;  %v1472_v47 = vld [vmem:[%s2255_s19 + $0x70] sm:$0xf]  ;;  %v1759_v48 = vld [vmem:[%s2255_s19 + $0x74] sm:$0xf0]  ;;  %v1490_v58 = vld [vmem:[%s2255_s19 + $0x98] sm:$0xf0] }
  0x2b   : > { %v1791_v51 = vld [vmem:[%s2255_s19 + $0x174] sm:$0xf0]  ;;  %v1473_v53 = vor.u32 %v1759_v48, %v1472_v47  ;;  %v1796_v59 = vld [vmem:[%s2255_s19 + $0x1a4] sm:$0xf]  ;;  %v1626_v60 = vld [vmem:[%s2255_s19 + $0x1a8] sm:$0xf0] }
  0x2c   : > { %v1761_v63 = vld [vmem:[%s2255_s19 + $0x84] sm:$0xf0]  ;;  %v1608_v2 = vld [vmem:[%s2255_s19 + $0x180] sm:$0xf]  ;;  %v1798_v19 = vld [vmem:[%s2255_s19 + $0x1b4] sm:$0xf] }
  0x2d   : > { %763 = vmatpush.bf16.msra.mxu0 %v1809_v20  ;;  %2015 = vmatpush.bf16.msra.mxu2 %v1809_v20  ;;  %v1790_v20 = vld [vmem:[%s2255_s19 + $0x174] sm:$0xf]  ;;  %v2374_v8 = vld [vmem:[%s2636_s2] ss:$0 sm:$0xff]  ;;  %v1763_v23 = vld [vmem:[%s2255_s19 + $0x94] sm:$0xf0] }
  0x2e   : > { %v1605_v27 = vor.u32 %v1790_v20, %v1602_v21  ;;  %v1634_v20 = vld [vmem:[%s2255_s19 + $0x1b8] sm:$0xf0]  ;;  %v1642_v47 = vld [vmem:[%s2255_s19 + $0x1c8] sm:$0xf0]  ;;  %s2098_s5 = scalar_lea.hbm %s2637_s3, 512 }
  0x2f   : > { %p2100_p2 = scmp.lt.s32.totalorder %s2098_s5, %s2094_s29 }
  0x31   : > { %764 = vmatpush.bf16.msra.mxu0 %v1808_v26  ;;  %2016 = vmatpush.bf16.msra.mxu2 %v1808_v26  ;;  %v1787_v26 = vld [vmem:[%s2255_s19 + $0x154] sm:$0xf0]  ;;  %p2101_p3 = por %p2100_p2, %p2099_p1 }
  0x32   : > { %1707 = vmatmul.msk.bf16.gmra.mxu1 %vm653_vm2, %v1429_v25  ;;  %1724 = vmatmul.msk.bf16.gmra.mxu3 %vm653_vm2, %v1565_v31  ;;  %v1584_v25 = vld [vmem:[%s2255_s19 + $0x150] sm:$0xf]  ;;  %v1474_v31 = vld [vmem:[%s2255_s19 + $0x78] sm:$0xf0] }
  0x33   : > { %v1585_v29 = vor.u32 %v1787_v26, %v1584_v25  ;;  %v1477_v34 = vor.u32 %v1758_v30, %v1474_v31  ;;  %v1637_v30 = vor.u32 %v1798_v19, %v1634_v20  ;;  %v1802_v19 = vld [vmem:[%s2255_s19 + $0x1d4] sm:$0xf]  ;;  %v1650_v20 = vld [vmem:[%s2255_s19 + $0x1d8] sm:$0xf0]  ;;  %p2102_p5 = pnand %p2101_p3, %p2097_p0 }
  0x34   : > { %765 = vmatmul.bf16.vlgmr.msra.gmra.mxu0 %v1417_v32  ;;  %845 = vmatmul.bf16.vlgmr.msra.gmra.mxu2 %v1545_v33  ;;  %v1792_v32 = vld [vmem:[%s2255_s19 + $0x184] sm:$0xf]  ;;  %v1610_v33 = vld [vmem:[%s2255_s19 + $0x188] sm:$0xf0] }
  0x35   : > { %v1613_v39 = vor.u32 %v1792_v32, %v1610_v33 }
  0x42   : > { %1708 = vmatmul.msk.bf16.gmra.mxu1 %vm653_vm2, %v1437_v38  ;;  %1725 = vmatmul.msk.bf16.gmra.mxu3 %vm653_vm2, %v1573_v43  ;;  %v1789_v38 = vld [vmem:[%s2255_s19 + $0x164] sm:$0xf0]  ;;  %v1482_v43 = vld [vmem:[%s2255_s19 + $0x88] sm:$0xf0] }
  0x43   : > { %v1593_v41 = vor.u32 %v1789_v38, %v1592_v37  ;;  %v1485_v46 = vor.u32 %v1760_v42, %v1482_v43  ;;  %v1766_v43 = vld [vmem:[%s2255_s19 + $0xb4] sm:$0xf] }
  0x44   : > { %770 = vmatmul.bf16.gmra.mxu0 %v1425_v44  ;;  %850 = vmatmul.bf16.gmra.mxu2 %v1553_v45  ;;  %v1794_v44 = vld [vmem:[%s2255_s19 + $0x194] sm:$0xf]  ;;  %v1618_v45 = vld [vmem:[%s2255_s19 + $0x198] sm:$0xf0] }
  0x45   : > { %v1621_v52 = vor.u32 %v1794_v44, %v1618_v45  ;;  %v1506_v44 = vld [vmem:[%s2255_s19 + $0xb8] sm:$0xf0] }
  0x52   : > { %1709 = vmatmul.msk.bf16.gmra.mxu1 %vm653_vm2, %v1445_v50  ;;  %1726 = vmatmul.msk.bf16.gmra.mxu3 %vm653_vm2, %v1581_v55  ;;  %v1600_v50 = vld [vmem:[%s2255_s19 + $0x170] sm:$0xf] }
  0x53   : > { %v1601_v54 = vor.u32 %v1791_v51, %v1600_v50  ;;  %v1496_v50 = vld [vmem:[%s2255_s19 + $0xa0] sm:$0xf]  ;;  %v1765_v51 = vld [vmem:[%s2255_s19 + $0xa4] sm:$0xf0] }
  0x54   : > { %775 = vmatmul.bf16.gmra.mxu0 %v1433_v56  ;;  %855 = vmatmul.bf16.gmra.mxu2 %v1561_v57  ;;  %v1762_v57 = vld [vmem:[%s2255_s19 + $0x94] sm:$0xf] }
  0x55   : > { %v1493_v61 = vor.u32 %v1762_v57, %v1490_v58  ;;  %v1624_v57 = vld [vmem:[%s2255_s19 + $0x1a0] sm:$0xf]  ;;  %v1797_v58 = vld [vmem:[%s2255_s19 + $0x1a4] sm:$0xf0] }
  0x62   : > { %1710 = vmatmul.msk.bf16.gmra.mxu1 %vm653_vm2, %v1453_v62  ;;  %1727 = vmatmul.msk.bf16.gmra.mxu3 %vm653_vm2, %v1589_v3  ;;  %v1480_v62 = vld [vmem:[%s2255_s19 + $0x80] sm:$0xf]  ;;  %v1793_v3 = vld [vmem:[%s2255_s19 + $0x184] sm:$0xf0] }
  0x63   : > { %v1609_v7 = vor.u32 %v1793_v3, %v1608_v2  ;;  %v1625_v3 = vor.u32 %v1797_v58, %v1624_v57  ;;  %v1804_v57 = vld [vmem:[%s2255_s19 + $0x1e4] sm:$0xf]  ;;  %v1658_v58 = vld [vmem:[%s2255_s19 + $0x1e8] sm:$0xf0] }
  0x64   : > { %780 = vmatmul.bf16.gmra.mxu0 %v1441_v4  ;;  %860 = vmatmul.bf16.gmra.mxu2 %v1569_v5  ;;  %v1629_v4 = vor.u32 %v1796_v59, %v1626_v60  ;;  %v1481_v5 = vor.u32 %v1761_v63, %v1480_v62  ;;  %v1497_v62 = vor.u32 %v1765_v51, %v1496_v50  ;;  %v1770_v51 = vld [vmem:[%s2255_s19 + $0xd4] sm:$0xf] }
  0x72   : > { %1711 = vmatmul.msk.bf16.gmra.mxu1 %vm653_vm2, %v1461_v10  ;;  %1728 = vmatmul.msk.bf16.gmra.mxu3 %vm653_vm2, %v1597_v15 }
  0x74   : > { %785 = vmatmul.bf16.gmra.mxu0 %v1449_v16  ;;  %865 = vmatmul.bf16.gmra.mxu2 %v1577_v17  ;;  %v1764_v16 = vld [vmem:[%s2255_s19 + $0xa4] sm:$0xf]  ;;  %v1498_v17 = vld [vmem:[%s2255_s19 + $0xa8] sm:$0xf0] }
  0x75   : > { %v1501_v21 = vor.u32 %v1764_v16, %v1498_v17  ;;  %v1768_v16 = vld [vmem:[%s2255_s19 + $0xc4] sm:$0xf]  ;;  %v1514_v17 = vld [vmem:[%s2255_s19 + $0xc8] sm:$0xf0] }
  0x82   : > { %1712 = vmatmul.msk.bf16.gmra.mxu1 %vm653_vm2, %v1469_v22  ;;  %1729 = vmatmul.msk.bf16.gmra.mxu3 %vm653_vm2, %v1605_v27  ;;  %v1488_v22 = vld [vmem:[%s2255_s19 + $0x90] sm:$0xf] }
  0x83   : > { %v1489_v33 = vor.u32 %v1763_v23, %v1488_v22  ;;  %v1517_v22 = vor.u32 %v1768_v16, %v1514_v17  ;;  %v1504_v23 = vld [vmem:[%s2255_s19 + $0xb0] sm:$0xf] }
  0x84   : > { %790 = vmatmul.bf16.gmra.mxu0 %v1457_v28  ;;  %870 = vmatmul.bf16.gmra.mxu2 %v1585_v29  ;;  %v1616_v28 = vld [vmem:[%s2255_s19 + $0x190] sm:$0xf]  ;;  %v1795_v29 = vld [vmem:[%s2255_s19 + $0x194] sm:$0xf0] }
  0x85   : > { %v1617_v35 = vor.u32 %v1795_v29, %v1616_v28 }
  0x92   : > { %1713 = vmatmul.msk.bf16.gmra.mxu1 %vm653_vm2, %v1477_v34  ;;  %1730 = vmatmul.msk.bf16.gmra.mxu3 %vm653_vm2, %v1613_v39 }
  0x94   : > { %795 = vmatmul.bf16.gmra.mxu0 %v1465_v40  ;;  %875 = vmatmul.bf16.gmra.mxu2 %v1593_v41 }
  0x9f   : > { %v935_v49 = vpop.f32.mrf.mxu1 }
  0xa2   : > { %1714 = vmatmul.msk.bf16.gmra.mxu1 %vm653_vm2, %v1485_v46  ;;  %1731 = vmatmul.msk.bf16.gmra.mxu3 %vm653_vm2, %v1621_v52  ;;  %v1800_v46 = vld [vmem:[%s2255_s19 + $0x1c4] sm:$0xf] }
  0xa3   : > { %v1645_v59 = vor.u32 %v1800_v46, %v1642_v47 }
  0xa4   : > { %800 = vmatmul.bf16.gmra.mxu0 %v1473_v53  ;;  %880 = vmatmul.bf16.gmra.mxu2 %v1601_v54 }
  0xa5   : > { %v2358_v55 = vpop.f32.mrf.mxu3 }
  0xa7   : > { %v937_v56 = vpop.f32.mrf.mxu1 }
  0xad   : > { %v2366_v0 = vpop.f32.mrf.mxu3 }
  0xaf   : > { %v940_v1 = vpop.f32.mrf.mxu1 }
  0xb1   : > { %v766_v6 = vpop.f32.mrf.mxu0 }
  0xb2   : > { %1715 = vmatmul.msk.bf16.gmra.mxu1 %vm653_vm2, %v1493_v61  ;;  %1732 = vmatmul.msk.bf16.gmra.mxu3 %vm653_vm2, %v1629_v4  ;;  %v767_v10 = vadd.f32 %v2374_v8, %v766_v6 }
  0xb4   : > { %805 = vmatmul.bf16.gmra.mxu0 %v1481_v5  ;;  %885 = vmatmul.bf16.gmra.mxu2 %v1609_v7  ;;  %v936_v14 = vadd.f32 %v935_v49, %v767_v10  ;;  %v1509_v49 = vor.u32 %v1766_v43, %v1506_v44 }
  0xb5   : > { %v2377_v9 = vpop.f32.mrf.mxu3 }
  0xb6   : > { %v1095_v25 = vmax.f32 %v936_v14, 0.0 }
  0xb7   : > { %v942_v11 = vpop.f32.mrf.mxu1  ;;  %v2380_v12 = vpop.f32.mrf.mxu2 }
  0xb9   : > { %v768_v13 = vpop.f32.mrf.mxu0 }
  0xba   : > { %v769_v15 = vadd.f32 %v2374_v8, %v768_v13 }
  0xbc   : > { %v938_v18 = vadd.f32 %v937_v56, %v769_v15 }
  0xbd   : > { %v2392_v24 = vpop.f32.mrf.mxu3 }
  0xbe   : > { %v1096_v26 = vmax.f32 %v938_v18, 0.0 }
  0xbf   : > { %v945_v27 = vpop.f32.mrf.mxu1  ;;  %v2396_v32 = vpop.f32.mrf.mxu2 }
  0xc0   : > { %v1821_v31 = vpack.c.bf16 %v1096_v26, %v1095_v25  ;;  %v1767_v25 = vld [vmem:[%s2255_s19 + $0xb4] sm:$0xf0] }
  0xc1   : > { %v771_v34 = vpop.f32.mrf.mxu0 }
  0xc2   : > { %1716 = vmatmul.msk.bf16.gmra.mxu1 %vm653_vm2, %v1501_v21  ;;  %1822 = vst [vmem:[%s2399_s11] sm:$0xff] %v1821_v31   ;;  %1733 = vmatmul.msk.bf16.gmra.mxu3 %vm653_vm2, %v1637_v30  ;;  %v772_v37 = vadd.f32 %v2374_v8, %v771_v34  ;;  %v1799_v31 = vld [vmem:[%s2255_s19 + $0x1b4] sm:$0xf0] }
  0xc4   : > { %810 = vmatmul.bf16.gmra.mxu0 %v1489_v33  ;;  %890 = vmatmul.bf16.gmra.mxu2 %v1617_v35  ;;  %v941_v41 = vadd.f32 %v940_v1, %v772_v37  ;;  %v1653_v33 = vor.u32 %v1802_v19, %v1650_v20  ;;  %v1505_v37 = vor.u32 %v1767_v25, %v1504_v23  ;;  %v1772_v25 = vld [vmem:[%s2255_s19 + $0xe4] sm:$0xf] }
  0xc5   : > { %v2403_v36 = vpop.f32.mrf.mxu3 }
  0xc6   : > { %v1097_v53 = vmax.f32 %v941_v41, 0.0 }
  0xc7   : > { %v947_v38 = vpop.f32.mrf.mxu1  ;;  %v851_v39 = vpop.f32.mrf.mxu2 }
  0xc8   : > { %v852_v48 = vadd.f32 %v2374_v8, %v851_v39 }
  0xc9   : > { %v773_v40 = vpop.f32.mrf.mxu0 }
  0xca   : > { %v774_v42 = vadd.f32 %v2374_v8, %v773_v40  ;;  %v1021_v63 = vadd.f32 %v2358_v55, %v852_v48 }
  0xcc   : > { %v943_v45 = vadd.f32 %v942_v11, %v774_v42  ;;  %v1129_v5 = vmax.f32 %v1021_v63, 0.0 }
  0xcd   : > { %v2414_v52 = vpop.f32.mrf.mxu3 }
  0xce   : > { %v1098_v54 = vmax.f32 %v943_v45, 0.0 }
  0xcf   : > { %v2416_v56 = vpop.f32.mrf.mxu1  ;;  %v853_v61 = vpop.f32.mrf.mxu2 }
  0xd0   : > { %v1826_v60 = vpack.c.bf16 %v1098_v54, %v1097_v53  ;;  %v854_v1 = vadd.f32 %v2374_v8, %v853_v61  ;;  %v1522_v53 = vld [vmem:[%s2255_s19 + $0xd8] sm:$0xf0]  ;;  %v1512_v61 = vld [vmem:[%s2255_s19 + $0xc0] sm:$0xf] }
  0xd1   : > { %v776_v2 = vpop.f32.mrf.mxu0 }
  0xd2   : > { %1717 = vmatmul.msk.bf16.gmra.mxu1 %vm653_vm2, %v1509_v49  ;;  %1978 = vst [vmem:[%s2399_s11 + $0x8] sm:$0xff] %v1826_v60   ;;  %1734 = vmatmul.msk.bf16.gmra.mxu3 %vm653_vm2, %v1645_v59  ;;  %v1023_v4 = vadd.f32 %v2366_v0, %v854_v1  ;;  %v777_v7 = vadd.f32 %v2374_v8, %v776_v2 }
  0xd3   : > { %v1525_v60 = vor.u32 %v1770_v51, %v1522_v53 }
  0xd4   : > { %815 = vmatmul.bf16.gmra.mxu0 %v1497_v62  ;;  %v1130_v6 = vmax.f32 %v1023_v4, 0.0  ;;  %895 = vmatmul.bf16.gmra.mxu2 %v1625_v3  ;;  %v946_v15 = vadd.f32 %v945_v27, %v777_v7  ;;  %v1632_v27 = vld [vmem:[%s2255_s19 + $0x1b0] sm:$0xf]  ;;  %v1769_v62 = vld [vmem:[%s2255_s19 + $0xc4] sm:$0xf0] }
  0xd5   : > { %v2426_v55 = vpop.f32.mrf.mxu3  ;;  %v1633_v41 = vor.u32 %v1799_v31, %v1632_v27  ;;  %v1801_v4 = vld [vmem:[%s2255_s19 + $0x1c4] sm:$0xf0]  ;;  %v1806_v27 = vld [vmem:[%s2255_s19 + $0x1f4] sm:$0xf]  ;;  %v1666_v31 = vld [vmem:[%s2255_s19 + $0x1f8] sm:$0xf0] }
  0xd6   : > { %v1906_v11 = vpack.c.bf16 %v1130_v6, %v1129_v5  ;;  %v1099_v28 = vmax.f32 %v946_v15, 0.0  ;;  %v1661_v5 = vor.u32 %v1804_v57, %v1658_v58 }
  0xd7   : > { %v952_v10 = vpop.f32.mrf.mxu1  ;;  %v856_v13 = vpop.f32.mrf.mxu2 }
  0xd8   : > { %1994 = vst [vmem:[%s2399_s11 + $0x88] sm:$0xff] %v1906_v11   ;;  %v857_v21 = vadd.f32 %v2374_v8, %v856_v13 }
  0xd9   : > { %v778_v14 = vpop.f32.mrf.mxu0 }
  0xda   : > { %v779_v0 = vadd.f32 %v2374_v8, %v778_v14 }
  0xdc   : > { %v948_v18 = vadd.f32 %v947_v38, %v779_v0  ;;  %v1026_v38 = vadd.f32 %v2377_v9, %v857_v21 }
  0xdd   : > { %v2438_v26 = vpop.f32.mrf.mxu3 }
  0xde   : > { %v1100_v29 = vmax.f32 %v948_v18, 0.0  ;;  %v1131_v43 = vmax.f32 %v1026_v38, 0.0 }
  0xdf   : > { %v2440_v30 = vpop.f32.mrf.mxu1  ;;  %v858_v35 = vpop.f32.mrf.mxu2 }
  0xe0   : > { %v1831_v34 = vpack.c.bf16 %v1100_v29, %v1099_v28  ;;  %v859_v39 = vadd.f32 %v2374_v8, %v858_v35  ;;  %v1530_v28 = vld [vmem:[%s2255_s19 + $0xe8] sm:$0xf0]  ;;  %v1520_v35 = vld [vmem:[%s2255_s19 + $0xd0] sm:$0xf] }
  0xe1   : > { %v781_v40 = vpop.f32.mrf.mxu0 }
  0xe2   : > { %1718 = vmatmul.msk.bf16.gmra.mxu1 %vm653_vm2, %v1517_v22  ;;  %1979 = vst [vmem:[%s2399_s11 + $0x10] sm:$0xff] %v1831_v34   ;;  %1735 = vmatmul.msk.bf16.gmra.mxu3 %vm653_vm2, %v1653_v33  ;;  %v1028_v42 = vadd.f32 %v2392_v24, %v859_v39  ;;  %v782_v45 = vadd.f32 %v2374_v8, %v781_v40 }
  0xe3   : > { %v1533_v34 = vor.u32 %v1772_v25, %v1530_v28 }
  0xe4   : > { %820 = vmatmul.bf16.gmra.mxu0 %v1505_v37  ;;  %v1132_v44 = vmax.f32 %v1028_v42, 0.0  ;;  %900 = vmatmul.bf16.gmra.mxu2 %v1633_v41  ;;  %v951_v24 = vadd.f32 %v2416_v56, %v782_v45  ;;  %v1640_v56 = vld [vmem:[%s2255_s19 + $0x1c0] sm:$0xf]  ;;  %v1771_v37 = vld [vmem:[%s2255_s19 + $0xd4] sm:$0xf0] }
  0xe5   : > { %v2450_v9 = vpop.f32.mrf.mxu3  ;;  %v1641_v15 = vor.u32 %v1801_v4, %v1640_v56  ;;  %v1648_v41 = vld [vmem:[%s2255_s19 + $0x1d0] sm:$0xf]  ;;  %v1803_v42 = vld [vmem:[%s2255_s19 + $0x1d4] sm:$0xf0] }
  0xe6   : > { %v1911_v47 = vpack.c.bf16 %v1132_v44, %v1131_v43  ;;  %v1101_v1 = vmax.f32 %v951_v24, 0.0  ;;  %v1649_v24 = vor.u32 %v1803_v42, %v1648_v41  ;;  %v1775_v41 = vld [vmem:[%s2255_s19 + $0xf4] sm:$0xf0] }
  0xe7   : > { %v957_v46 = vpop.f32.mrf.mxu1  ;;  %v861_v48 = vpop.f32.mrf.mxu2 }
  0xe8   : > { %1995 = vst [vmem:[%s2399_s11 + $0x90] sm:$0xff] %v1911_v47   ;;  %v862_v59 = vadd.f32 %v2374_v8, %v861_v48  ;;  %v1521_v47 = vor.u32 %v1771_v37, %v1520_v35 }
  0xe9   : > { %v783_v49 = vpop.f32.mrf.mxu0 }
  0xea   : > { %v784_v50 = vadd.f32 %v2374_v8, %v783_v49  ;;  %v1031_v11 = vadd.f32 %v2403_v36, %v862_v59 }
  0xec   : > { %v953_v54 = vadd.f32 %v952_v10, %v784_v50  ;;  %v1513_v10 = vor.u32 %v1769_v62, %v1512_v61  ;;  %v1133_v16 = vmax.f32 %v1031_v11, 0.0  ;;  %v1774_v62 = vld [vmem:[%s2255_s19 + $0xf4] sm:$0xf] }
  0xed   : > { %v2463_v63 = vpop.f32.mrf.mxu3 }
  0xee   : > { %v1102_v2 = vmax.f32 %v953_v54, 0.0 }
  0xef   : > { %v2465_v3 = vpop.f32.mrf.mxu1  ;;  %v863_v7 = vpop.f32.mrf.mxu2 }
  0xf0   : > { %v1836_v6 = vpack.c.bf16 %v1102_v2, %v1101_v1  ;;  %v864_v13 = vadd.f32 %v2374_v8, %v863_v7  ;;  %v1538_v1 = vld [vmem:[%s2255_s19 + $0xf8] sm:$0xf0] }
  0xf1   : > { %v786_v14 = vpop.f32.mrf.mxu0  ;;  %v1541_v4 = vor.u32 %v1774_v62, %v1538_v1 }
  0xf2   : > { %1719 = vmatmul.msk.bf16.gmra.mxu1 %vm653_vm2, %v1525_v60  ;;  %1980 = vst [vmem:[%s2399_s11 + $0x18] sm:$0xff] %v1836_v6   ;;  %1736 = vmatmul.msk.bf16.gmra.mxu3 %vm653_vm2, %v1661_v5  ;;  %v1033_v0 = vadd.f32 %v2414_v52, %v864_v13  ;;  %v787_v18 = vadd.f32 %v2374_v8, %v786_v14  ;;  %v1528_v5 = vld [vmem:[%s2255_s19 + $0xe0] sm:$0xf]  ;;  %v1773_v6 = vld [vmem:[%s2255_s19 + $0xe4] sm:$0xf0] }
  0xf3   : > { %v1656_v13 = vld [vmem:[%s2255_s19 + $0x1e0] sm:$0xf]  ;;  %v1805_v14 = vld [vmem:[%s2255_s19 + $0x1e4] sm:$0xf0] }
  0xf4   : > { %825 = vmatmul.bf16.gmra.mxu0 %v1513_v10  ;;  %v1134_v17 = vmax.f32 %v1033_v0, 0.0  ;;  %905 = vmatmul.bf16.gmra.mxu2 %v1641_v15  ;;  %v956_v52 = vadd.f32 %v2440_v30, %v787_v18  ;;  %v1669_v30 = vor.u32 %v1806_v27, %v1666_v31 }
  0xf5   : > { %v2475_v36 = vpop.f32.mrf.mxu3 }
  0xf6   : > { %v1916_v20 = vpack.c.bf16 %v1134_v17, %v1133_v16  ;;  %v1103_v38 = vmax.f32 %v956_v52, 0.0  ;;  %v1529_v16 = vor.u32 %v1773_v6, %v1528_v5 }
  0xf7   : > { %v962_v19 = vpop.f32.mrf.mxu1  ;;  %v866_v21 = vpop.f32.mrf.mxu2 }
  0xf8   : > { %1996 = vst [vmem:[%s2399_s11 + $0x98] sm:$0xff] %v1916_v20   ;;  %v867_v33 = vadd.f32 %v2374_v8, %v866_v21 }
  0xf9   : > { %v788_v22 = vpop.f32.mrf.mxu0 }
  0xfa   : > { %v789_v23 = vadd.f32 %v2374_v8, %v788_v22 }
  0xfc   : > { %v958_v29 = vadd.f32 %v957_v46, %v789_v23  ;;  %v1036_v46 = vadd.f32 %v2426_v55, %v867_v33  ;;  %v1776_v33 = vld [vmem:[%s2255_s19 + $0x104] sm:$0xf] }
  0xfd   : > { %v2490_v43 = vpop.f32.mrf.mxu3 }
  0xfe   : > { %v1104_v39 = vmax.f32 %v958_v29, 0.0  ;;  %v1135_v51 = vmax.f32 %v1036_v46, 0.0 }
  0xff   : > { %v965_v40 = vpop.f32.mrf.mxu1  ;;  %v868_v45 = vpop.f32.mrf.mxu2 }
 0x100   : > { %v1841_v44 = vpack.c.bf16 %v1104_v39, %v1103_v38  ;;  %v869_v48 = vadd.f32 %v2374_v8, %v868_v45  ;;  %v1536_v39 = vld [vmem:[%s2255_s19 + $0xf0] sm:$0xf] }
 0x101   : > { %v791_v49 = vpop.f32.mrf.mxu0  ;;  %v1664_v45 = vld [vmem:[%s2255_s19 + $0x1f0] sm:$0xf] }
 0x102   : > { %1720 = vmatmul.msk.bf16.gmra.mxu1 %vm653_vm2, %v1533_v34  ;;  %1981 = vst [vmem:[%s2399_s11 + $0x20] sm:$0xff] %v1841_v44   ;;  %1737 = vmatmul.msk.bf16.gmra.mxu3 %vm653_vm2, %v1669_v30  ;;  %v1038_v50 = vadd.f32 %v2438_v26, %v869_v48  ;;  %v792_v55 = vadd.f32 %v2374_v8, %v791_v49 }
 0x103   : > { %v1537_v48 = vor.u32 %v1775_v41, %v1536_v39 }
 0x104   : > { %830 = vmatmul.bf16.gmra.mxu0 %v1521_v47  ;;  %v1136_v53 = vmax.f32 %v1038_v50, 0.0  ;;  %910 = vmatmul.bf16.gmra.mxu2 %v1649_v24  ;;  %v961_v61 = vadd.f32 %v2465_v3, %v792_v55  ;;  %v1807_v47 = vld [vmem:[%s2255_s19 + $0x1f4] sm:$0xf0] }
 0x105   : > { %v2499_v59 = vpop.f32.mrf.mxu3 }
 0x106   : > { %v1921_v57 = vpack.c.bf16 %v1136_v53, %v1135_v51  ;;  %v1105_v7 = vmax.f32 %v961_v61, 0.0  ;;  %v1665_v51 = vor.u32 %v1807_v47, %v1664_v45 }
 0x107   : > { %v967_v54 = vpop.f32.mrf.mxu1  ;;  %v871_v58 = vpop.f32.mrf.mxu2 }
 0x108   : > { %1997 = vst [vmem:[%s2399_s11 + $0xa0] sm:$0xff] %v1921_v57   ;;  %v872_v56 = vadd.f32 %v2374_v8, %v871_v58 }
 0x109   : > { %v793_v60 = vpop.f32.mrf.mxu0 }
 0x10a   : > { %v794_v26 = vadd.f32 %v2374_v8, %v793_v60  ;;  %v1041_v3 = vadd.f32 %v2450_v9, %v872_v56 }
 0x10c   : > { %v963_v2 = vadd.f32 %v962_v19, %v794_v26  ;;  %v1657_v19 = vor.u32 %v1805_v14, %v1656_v13  ;;  %v1137_v22 = vmax.f32 %v1041_v3, 0.0 }
 0x10d   : > { %v1052_v20 = vpop.f32.mrf.mxu3 }
 0x10e   : > { %v1106_v10 = vmax.f32 %v963_v2, 0.0 }
 0x10f   : > { %v970_v11 = vpop.f32.mrf.mxu1  ;;  %v873_v0 = vpop.f32.mrf.mxu2 }
 0x110   : > { %v1846_v15 = vpack.c.bf16 %v1106_v10, %v1105_v7  ;;  %v874_v17 = vadd.f32 %v2374_v8, %v873_v0 }
 0x111   : > { %v796_v18 = vpop.f32.mrf.mxu0 }
 0x112   : > { %1721 = vmatmul.msk.bf16.gmra.mxu1 %vm653_vm2, %v1541_v4  ;;  %1982 = vst [vmem:[%s2399_s11 + $0x28] sm:$0xff] %v1846_v15   ;;  %v1043_v21 = vadd.f32 %v2463_v63, %v874_v17  ;;  %v797_v9 = vadd.f32 %v2374_v8, %v796_v18  ;;  %v1546_v63 = vld [vmem:[%s2255_s19 + $0x108] sm:$0xf0] }
 0x113   : > { %v1549_v38 = vor.u32 %v1776_v33, %v1546_v63 }
 0x114   : > { %835 = vmatmul.bf16.gmra.mxu0 %v1529_v16  ;;  %v1138_v52 = vmax.f32 %v1043_v21, 0.0  ;;  %915 = vmatmul.bf16.gmra.mxu2 %v1657_v19  ;;  %v966_v27 = vadd.f32 %v965_v40, %v797_v9 }
 0x115   : > { %v2521_v35 = vpop.f32.mrf.mxu3 }
 0x116   : > { %v1926_v25 = vpack.c.bf16 %v1138_v52, %v1137_v22  ;;  %v1107_v42 = vmax.f32 %v966_v27, 0.0 }
 0x117   : > { %v972_v23 = vpop.f32.mrf.mxu1  ;;  %v876_v28 = vpop.f32.mrf.mxu2 }
 0x118   : > { %1998 = vst [vmem:[%s2399_s11 + $0xa8] sm:$0xff] %v1926_v25   ;;  %v877_v37 = vadd.f32 %v2374_v8, %v876_v28 }
 0x119   : > { %v798_v29 = vpop.f32.mrf.mxu0 }
 0x11a   : > { %v799_v31 = vadd.f32 %v2374_v8, %v798_v29  ;;  %v1046_v49 = vadd.f32 %v2475_v36, %v877_v37 }
 0x11c   : > { %v968_v34 = vadd.f32 %v967_v54, %v799_v31  ;;  %v1139_v55 = vmax.f32 %v1046_v49, 0.0 }
 0x11d   : > { %v1057_v60 = vpop.f32.mrf.mxu3 }
 0x11e   : > { %v1108_v30 = vmax.f32 %v968_v34, 0.0 }
 0x11f   : > { %v975_v44 = vpop.f32.mrf.mxu1  ;;  %v878_v40 = vpop.f32.mrf.mxu2 }
 0x120   : > { %v1851_v46 = vpack.c.bf16 %v1108_v30, %v1107_v42  ;;  %v879_v24 = vadd.f32 %v2374_v8, %v878_v40 }
 0x121   : > { %v801_v50 = vpop.f32.mrf.mxu0 }
 0x122   : > { %1722 = vmatmul.msk.bf16.gmra.mxu1 %vm653_vm2, %v1549_v38  ;;  %1983 = vst [vmem:[%s2399_s11 + $0x30] sm:$0xff] %v1851_v46   ;;  %v1048_v53 = vadd.f32 %v2490_v43, %v879_v24  ;;  %v802_v57 = vadd.f32 %v2374_v8, %v801_v50 }
 0x124   : > { %840 = vmatmul.bf16.gmra.mxu0 %v1537_v48  ;;  %v1140_v54 = vmax.f32 %v1048_v53, 0.0  ;;  %920 = vmatmul.bf16.gmra.mxu2 %v1665_v51  ;;  %v971_v62 = vadd.f32 %v970_v11, %v802_v57 }
 0x125   : > { %v1060_v10 = vpop.f32.mrf.mxu3 }
 0x126   : > { %v1931_v61 = vpack.c.bf16 %v1140_v54, %v1139_v55  ;;  %v1109_v43 = vmax.f32 %v971_v62, 0.0 }
 0x127   : > { %v977_v58 = vpop.f32.mrf.mxu1  ;;  %v881_v36 = vpop.f32.mrf.mxu2 }
 0x128   : > { %1999 = vst [vmem:[%s2399_s11 + $0xb0] sm:$0xff] %v1931_v61   ;;  %v882_v56 = vadd.f32 %v2374_v8, %v881_v36 }
 0x129   : > { %v803_v26 = vpop.f32.mrf.mxu0 }
 0x12a   : > { %v804_v1 = vadd.f32 %v2374_v8, %v803_v26  ;;  %v1051_v13 = vadd.f32 %v2499_v59, %v882_v56 }
 0x12c   : > { %v973_v2 = vadd.f32 %v972_v23, %v804_v1  ;;  %v1141_v11 = vmax.f32 %v1051_v13, 0.0 }
 0x12d   : > { %v1062_v9 = vpop.f32.mrf.mxu3 }
 0x12e   : > { %v1110_v4 = vmax.f32 %v973_v2, 0.0 }
 0x12f   : > { %v980_v5 = vpop.f32.mrf.mxu1  ;;  %v883_v7 = vpop.f32.mrf.mxu2 }
 0x130   : > { %v1856_v6 = vpack.c.bf16 %v1110_v4, %v1109_v43  ;;  %v884_v14 = vadd.f32 %v2374_v8, %v883_v7 }
 0x131   : > { %v806_v15 = vpop.f32.mrf.mxu0 }
 0x132   : > { %1984 = vst [vmem:[%s2399_s11 + $0x38] sm:$0xff] %v1856_v6   ;;  %v1053_v0 = vadd.f32 %v1052_v20, %v884_v14  ;;  %v807_v3 = vadd.f32 %v2374_v8, %v806_v15 }
 0x134   : > { %v1142_v16 = vmax.f32 %v1053_v0, 0.0  ;;  %v976_v22 = vadd.f32 %v975_v44, %v807_v3 }
 0x135   : > { %v1065_v37 = vpop.f32.mrf.mxu3 }
 0x136   : > { %v1936_v18 = vpack.c.bf16 %v1142_v16, %v1141_v11  ;;  %v1111_v25 = vmax.f32 %v976_v22, 0.0 }
 0x137   : > { %v982_v17 = vpop.f32.mrf.mxu1  ;;  %v886_v19 = vpop.f32.mrf.mxu2 }
 0x138   : > { %2000 = vst [vmem:[%s2399_s11 + $0xb8] sm:$0xff] %v1936_v18   ;;  %v887_v23 = vadd.f32 %v2374_v8, %v886_v19 }
 0x139   : > { %v808_v21 = vpop.f32.mrf.mxu0 }
 0x13a   : > { %v809_v52 = vadd.f32 %v2374_v8, %v808_v21  ;;  %v1056_v31 = vadd.f32 %v2521_v35, %v887_v23 }
 0x13c   : > { %v978_v59 = vadd.f32 %v977_v58, %v809_v52  ;;  %v1143_v38 = vmax.f32 %v1056_v31, 0.0 }
 0x13d   : > { %v1067_v50 = vpop.f32.mrf.mxu3 }
 0x13e   : > { %v1112_v28 = vmax.f32 %v978_v59, 0.0 }
 0x13f   : > { %v985_v20 = vpop.f32.mrf.mxu1  ;;  %v888_v27 = vpop.f32.mrf.mxu2 }
 0x140   : > { %v1861_v29 = vpack.c.bf16 %v1112_v28, %v1111_v25  ;;  %v889_v33 = vadd.f32 %v2374_v8, %v888_v27 }
 0x141   : > { %v811_v63 = vpop.f32.mrf.mxu0 }
 0x142   : > { %1985 = vst [vmem:[%s2399_s11 + $0x40] sm:$0xff] %v1861_v29   ;;  %v1058_v34 = vadd.f32 %v1057_v60, %v889_v33  ;;  %v812_v41 = vadd.f32 %v2374_v8, %v811_v63 }
 0x144   : > { %v1144_v39 = vmax.f32 %v1058_v34, 0.0  ;;  %v981_v47 = vadd.f32 %v980_v5, %v812_v41 }
 0x145   : > { %v1070_v2 = vpop.f32.mrf.mxu3 }
 0x146   : > { %v1941_v30 = vpack.c.bf16 %v1144_v39, %v1143_v38  ;;  %v1113_v48 = vmax.f32 %v981_v47, 0.0 }
 0x147   : > { %v987_v42 = vpop.f32.mrf.mxu1  ;;  %v891_v44 = vpop.f32.mrf.mxu2 }
 0x148   : > { %2001 = vst [vmem:[%s2399_s11 + $0xc0] sm:$0xff] %v1941_v30   ;;  %v892_v40 = vadd.f32 %v2374_v8, %v891_v44 }
 0x149   : > { %v813_v45 = vpop.f32.mrf.mxu0 }
 0x14a   : > { %v814_v46 = vadd.f32 %v2374_v8, %v813_v45  ;;  %v1061_v55 = vadd.f32 %v1060_v10, %v892_v40 }
 0x14c   : > { %v983_v35 = vadd.f32 %v982_v17, %v814_v46  ;;  %v1145_v60 = vmax.f32 %v1061_v55, 0.0 }
 0x14d   : > { %v1072_v3 = vpop.f32.mrf.mxu3 }
 0x14e   : > { %v1114_v49 = vmax.f32 %v983_v35, 0.0 }
 0x14f   : > { %v990_v24 = vpop.f32.mrf.mxu1  ;;  %v893_v53 = vpop.f32.mrf.mxu2 }
 0x150   : > { %v1866_v51 = vpack.c.bf16 %v1114_v49, %v1113_v48  ;;  %v894_v54 = vadd.f32 %v2374_v8, %v893_v53 }
 0x151   : > { %v816_v57 = vpop.f32.mrf.mxu0 }
 0x152   : > { %1986 = vst [vmem:[%s2399_s11 + $0x48] sm:$0xff] %v1866_v51   ;;  %v1063_v58 = vadd.f32 %v1062_v9, %v894_v54  ;;  %v817_v36 = vadd.f32 %v2374_v8, %v816_v57 }
 0x154   : > { %v1146_v61 = vmax.f32 %v1063_v58, 0.0  ;;  %v986_v43 = vadd.f32 %v985_v20, %v817_v36 }
 0x155   : > { %v1075_v20 = vpop.f32.mrf.mxu3 }
 0x156   : > { %v1946_v62 = vpack.c.bf16 %v1146_v61, %v1145_v60  ;;  %v1115_v7 = vmax.f32 %v986_v43, 0.0 }
 0x157   : > { %v992_v26 = vpop.f32.mrf.mxu1  ;;  %v896_v1 = vpop.f32.mrf.mxu2 }
 0x158   : > { %2002 = vst [vmem:[%s2399_s11 + $0xc8] sm:$0xff] %v1946_v62   ;;  %v897_v6 = vadd.f32 %v2374_v8, %v896_v1 }
 0x159   : > { %v818_v56 = vpop.f32.mrf.mxu0 }
 0x15a   : > { %v819_v4 = vadd.f32 %v2374_v8, %v818_v56  ;;  %v1066_v0 = vadd.f32 %v1065_v37, %v897_v6 }
 0x15c   : > { %v988_v5 = vadd.f32 %v987_v42, %v819_v4  ;;  %v1147_v18 = vmax.f32 %v1066_v0, 0.0 }
 0x15d   : > { %v1077_v47 = vpop.f32.mrf.mxu3 }
 0x15e   : > { %v1116_v10 = vmax.f32 %v988_v5, 0.0 }
 0x15f   : > { %v995_v13 = vpop.f32.mrf.mxu1  ;;  %v898_v15 = vpop.f32.mrf.mxu2 }
 0x160   : > { %v1871_v14 = vpack.c.bf16 %v1116_v10, %v1115_v7  ;;  %v899_v11 = vadd.f32 %v2374_v8, %v898_v15 }
 0x161   : > { %v821_v16 = vpop.f32.mrf.mxu0 }
 0x162   : > { %1987 = vst [vmem:[%s2399_s11 + $0x50] sm:$0xff] %v1871_v14   ;;  %v1068_v17 = vadd.f32 %v1067_v50, %v899_v11  ;;  %v822_v21 = vadd.f32 %v2374_v8, %v821_v16 }
 0x164   : > { %v1148_v19 = vmax.f32 %v1068_v17, 0.0  ;;  %v991_v23 = vadd.f32 %v990_v24, %v822_v21 }
 0x165   : > { %v1080_v58 = vpop.f32.mrf.mxu3 }
 0x166   : > { %v1951_v52 = vpack.c.bf16 %v1148_v19, %v1147_v18  ;;  %v1117_v27 = vmax.f32 %v991_v23, 0.0 }
 0x167   : > { %v997_v22 = vpop.f32.mrf.mxu1  ;;  %v901_v9 = vpop.f32.mrf.mxu2 }
 0x168   : > { %2003 = vst [vmem:[%s2399_s11 + $0xd0] sm:$0xff] %v1951_v52   ;;  %v902_v29 = vadd.f32 %v2374_v8, %v901_v9 }
 0x169   : > { %v823_v59 = vpop.f32.mrf.mxu0 }
 0x16a   : > { %v824_v25 = vadd.f32 %v2374_v8, %v823_v59  ;;  %v1071_v37 = vadd.f32 %v1070_v2, %v902_v29 }
 0x16c   : > { %v993_v28 = vadd.f32 %v992_v26, %v824_v25  ;;  %v1149_v42 = vmax.f32 %v1071_v37, 0.0 }
 0x16d   : > { %v1082_v10 = vpop.f32.mrf.mxu3 }
 0x16e   : > { %v1118_v31 = vmax.f32 %v993_v28, 0.0 }
 0x16f   : > { %v1000_v33 = vpop.f32.mrf.mxu1  ;;  %v903_v34 = vpop.f32.mrf.mxu2 }
 0x170   : > { %v1876_v63 = vpack.c.bf16 %v1118_v31, %v1117_v27  ;;  %v904_v38 = vadd.f32 %v2374_v8, %v903_v34 }
 0x171   : > { %v826_v39 = vpop.f32.mrf.mxu0 }
 0x172   : > { %1988 = vst [vmem:[%s2399_s11 + $0x58] sm:$0xff] %v1876_v63   ;;  %v1073_v41 = vadd.f32 %v1072_v3, %v904_v38  ;;  %v827_v44 = vadd.f32 %v2374_v8, %v826_v39 }
 0x174   : > { %v1150_v30 = vmax.f32 %v1073_v41, 0.0  ;;  %v996_v48 = vadd.f32 %v995_v13, %v827_v44 }
 0x176   : > { %v1956_v46 = vpack.c.bf16 %v1150_v30, %v1149_v42  ;;  %v1119_v51 = vmax.f32 %v996_v48, 0.0 }
 0x177   : > { %v1002_v45 = vpop.f32.mrf.mxu1  ;;  %v906_v35 = vpop.f32.mrf.mxu2 }
 0x178   : > { %2004 = vst [vmem:[%s2399_s11 + $0xd8] sm:$0xff] %v1956_v46   ;;  %v907_v50 = vadd.f32 %v2374_v8, %v906_v35  ;;  %v849_v46 = vadd.f32 %v2374_v8, %v2396_v32 }
 0x179   : > { %v828_v40 = vpop.f32.mrf.mxu0 }
 0x17a   : > { %v829_v49 = vadd.f32 %v2374_v8, %v828_v40  ;;  %v1076_v60 = vadd.f32 %v1075_v20, %v907_v50 }
 0x17c   : > { %v998_v24 = vadd.f32 %v997_v22, %v829_v49  ;;  %v1151_v62 = vmax.f32 %v1076_v60, 0.0  ;;  %v1085_v22 = vpop.f32.mrf.mxu3 }
 0x17e   : > { %v1120_v53 = vmax.f32 %v998_v24, 0.0 }
 0x17f   : > { %v1005_v55 = vpop.f32.mrf.mxu1  ;;  %v908_v57 = vpop.f32.mrf.mxu2 }
 0x180   : > { %v1881_v54 = vpack.c.bf16 %v1120_v53, %v1119_v51  ;;  %v909_v61 = vadd.f32 %v2374_v8, %v908_v57 }
 0x181   : > { %v831_v36 = vpop.f32.mrf.mxu0 }
 0x182   : > { %1989 = vst [vmem:[%s2399_s11 + $0x60] sm:$0xff] %v1881_v54   ;;  %v1078_v26 = vadd.f32 %v1077_v47, %v909_v61  ;;  %v832_v2 = vadd.f32 %v2374_v8, %v831_v36 }
 0x184   : > { %v1152_v1 = vmax.f32 %v1078_v26, 0.0  ;;  %v1001_v6 = vadd.f32 %v1000_v33, %v832_v2  ;;  %v1087_v37 = vpop.f32.mrf.mxu3 }
 0x186   : > { %v1961_v43 = vpack.c.bf16 %v1152_v1, %v1151_v62  ;;  %v1121_v15 = vmax.f32 %v1001_v6, 0.0 }
 0x187   : > { %v1007_v56 = vpop.f32.mrf.mxu1  ;;  %v911_v4 = vpop.f32.mrf.mxu2 }
 0x188   : > { %2005 = vst [vmem:[%s2399_s11 + $0xe0] sm:$0xff] %v1961_v43   ;;  %v912_v14 = vadd.f32 %v2374_v8, %v911_v4 }
 0x189   : > { %v833_v5 = vpop.f32.mrf.mxu0 }
 0x18a   : > { %v834_v7 = vadd.f32 %v2374_v8, %v833_v5  ;;  %v1081_v17 = vadd.f32 %v1080_v58, %v912_v14 }
 0x18c   : > { %v1003_v13 = vadd.f32 %v1002_v45, %v834_v7  ;;  %v1153_v52 = vmax.f32 %v1081_v17, 0.0  ;;  %v847_v45 = vadd.f32 %v2374_v8, %v2380_v12  ;;  %v1090_v53 = vpop.f32.mrf.mxu3 }
 0x18e   : > { %v1122_v0 = vmax.f32 %v1003_v13, 0.0 }
 0x18f   : > { %v1010_v11 = vpop.f32.mrf.mxu1  ;;  %v913_v3 = vpop.f32.mrf.mxu2 }
 0x190   : > { %v1886_v16 = vpack.c.bf16 %v1122_v0, %v1121_v15  ;;  %v914_v18 = vadd.f32 %v2374_v8, %v913_v3 }
 0x191   : > { %v836_v19 = vpop.f32.mrf.mxu0 }
 0x192   : > { %1990 = vst [vmem:[%s2399_s11 + $0x68] sm:$0xff] %v1886_v16   ;;  %v1083_v21 = vadd.f32 %v1082_v10, %v914_v18  ;;  %v837_v59 = vadd.f32 %v2374_v8, %v836_v19 }
 0x194   : > { %v1154_v9 = vmax.f32 %v1083_v21, 0.0  ;;  %v1006_v29 = vadd.f32 %v1005_v55, %v837_v59  ;;  %v1092_v4 = vpop.f32.mrf.mxu3 }
 0x196   : > { %v1966_v25 = vpack.c.bf16 %v1154_v9, %v1153_v52  ;;  %v1123_v63 = vmax.f32 %v1006_v29, 0.0 }
 0x197   : > { %v1012_v23 = vpop.f32.mrf.mxu1  ;;  %v916_v28 = vpop.f32.mrf.mxu2 }
 0x198   : > { %2006 = vst [vmem:[%s2399_s11 + $0xe8] sm:$0xff] %v1966_v25   ;;  %v917_v33 = vadd.f32 %v2374_v8, %v916_v28 }
 0x199   : > { %v838_v20 = vpop.f32.mrf.mxu0 }
 0x19a   : > { %v839_v27 = vadd.f32 %v2374_v8, %v838_v20  ;;  %v1086_v42 = vadd.f32 %v1085_v22, %v917_v33 }
 0x19c   : > { %v1008_v31 = vadd.f32 %v1007_v56, %v839_v27  ;;  %v1155_v35 = vmax.f32 %v1086_v42, 0.0 }
 0x19e   : > { %v1124_v34 = vmax.f32 %v1008_v31, 0.0 }
 0x19f   : > { %v1015_v38 = vpop.f32.mrf.mxu1  ;;  %v918_v41 = vpop.f32.mrf.mxu2 }
 0x1a0   : > { %v1891_v39 = vpack.c.bf16 %v1124_v34, %v1123_v63  ;;  %v919_v30 = vadd.f32 %v2374_v8, %v918_v41  ;;  %v1016_v40 = vadd.f32 %v1015_v38, %v847_v45 }
 0x1a1   : > { %v841_v44 = vpop.f32.mrf.mxu0 }
 0x1a2   : > { %1991 = vst [vmem:[%s2399_s11 + $0x70] sm:$0xff] %v1891_v39   ;;  %v1088_v47 = vadd.f32 %v1087_v37, %v919_v30  ;;  %v842_v49 = vadd.f32 %v2374_v8, %v841_v44  ;;  %v1127_v54 = vmax.f32 %v1016_v40, 0.0 }
 0x1a4   : > { %v1156_v48 = vmax.f32 %v1088_v47, 0.0  ;;  %v1011_v58 = vadd.f32 %v1010_v11, %v842_v49 }
 0x1a6   : > { %v1971_v50 = vpack.c.bf16 %v1156_v48, %v1155_v35  ;;  %v1125_v26 = vmax.f32 %v1011_v58, 0.0 }
 0x1a7   : > { %v1017_v24 = vpop.f32.mrf.mxu1  ;;  %v921_v55 = vpop.f32.mrf.mxu2 }
 0x1a8   : > { %v1018_v51 = vadd.f32 %v1017_v24, %v849_v46  ;;  %2007 = vst [vmem:[%s2399_s11 + $0xf0] sm:$0xff] %v1971_v50   ;;  %v922_v36 = vadd.f32 %v2374_v8, %v921_v55 }
 0x1a9   : > { %v843_v12 = vpop.f32.mrf.mxu0 }
 0x1aa   : > { %v1128_v57 = vmax.f32 %v1018_v51, 0.0  ;;  %v844_v32 = vadd.f32 %v2374_v8, %v843_v12  ;;  %v1091_v56 = vadd.f32 %v1090_v53, %v922_v36 }
 0x1ac   : > { %v1901_v60 = vpack.c.bf16 %v1128_v57, %v1127_v54  ;;  %v1013_v61 = vadd.f32 %v1012_v23, %v844_v32  ;;  %v1157_v6 = vmax.f32 %v1091_v56, 0.0 }
 0x1ae   : > { %1993 = vst [vmem:[%s2399_s11 + $0x80] sm:$0xff] %v1901_v60   ;;  %v1126_v62 = vmax.f32 %v1013_v61, 0.0 }
 0x1af   : > { %v923_v2 = vpop.f32.mrf.mxu2 }
 0x1b0   : > { %v1896_v1 = vpack.c.bf16 %v1126_v62, %v1125_v26  ;;  %v924_v43 = vadd.f32 %v2374_v8, %v923_v2 }
 0x1b2   : > { %1992 = vst [vmem:[%s2399_s11 + $0x78] sm:$0xff] %v1896_v1   ;;  %v1093_v5 = vadd.f32 %v1092_v4, %v924_v43 }
 0x1b4   : > { %v1158_v7 = vmax.f32 %v1093_v5, 0.0 }
 0x1b6   : > { %v1976_v10 = vpack.c.bf16 %v1158_v7, %v1157_v6 }
 0x1b8   : > { %2008 = vst [vmem:[%s2399_s11 + $0xf8] sm:$0xff] %v1976_v10  }
 0x1b9   : > { %2105 = shalt.err (!%p2102_p5)
}
 0x1ba   : > { %s2159_s8 = smov 64   ;;  %s2160_s9 = smov 4  }
 0x1bb   : > { %2019 = dma.vmem_to_hbm [thread:$0]  (%p2221_p4), %s1302_s26, 4096, %s1304_s27, %s1288_s15, %s2159_s8, %s2159_s8, %s2160_s9  }
 0x1bc PF: > { %p2025_p6 = scmp.ge.s32.totalorder %s2156_s17, 2  ;;  %s1318_s10 = sand.u32 1, %s2136_s12  }
 0x1bd   : > { %s1319_s11 = scalar_lea.sflag [#allocation3], %s1318_s10 }
 0x1be   : > { %p2022_p7 = pnand %p2025_p6, %p2228_p8 }
 0x1c0   : > { %p2023_p9 = pneg %p2022_p7 }
 0x1c2   : > { %2131 = dma.done.wait (%p2023_p9), %s1319_s11, 4096  }
 0x1c3   : > { %2133 = vsyncadd (%p2023_p9), %s1319_s11, 4294963200  ;;  %s16_s17 = sadd.s32 1, %s2156_s17   ;;  %s2640_s12 = smov %s2140_s13 }
 0x1c4   : > { %p13_p10 = scmp.ge.s32.totalorder %s16_s17, 4   ;;  %s2641_s13 = smov %s2144_s14 }
 0x1c5   : > { %s2642_s14 = smov %s2234_s25  ;;  %s2643_s15 = smov %s2152_s16 }
 0x1c6   : > { %s2644_s16 = smov %s2646_s20  ;;  %15 = sbr.rel (!%p13_p10) target bundleno = 4 (0x4), region = 73 }
 0x1cb   :  { %1325 = vsyncpa [#allocation3], 1 }
 0x1cc   :  { %1327 = vsyncpa [#allocation3 + $0x1], 1 }

</bundles_post_ra>
